<compile_context>
chip_gen: v7x
topology: tpu7x:2x2x1
jax: 0.10.0
libtpu: 0.0.40
codegen_flags: <defaults>
</compile_context>

<pallas_src>
import functools

import jax
import jax.numpy as jnp
from jax.experimental import pallas as pl
from jax.experimental.pallas import tpu as pltpu


def _round_up(x, m):
    return ((x + m - 1) // m) * m


def _device_generation():
    try:
        kind = jax.devices()[0].device_kind.lower()
    except Exception:
        kind = ""
    if "v5 lite" in kind or "v5e" in kind or "v5lite" in kind:
        return "v5e"
    if "v6 lite" in kind or "v6e" in kind or "v6lite" in kind:
        return "v6e"
    if "v7" in kind:
        return "v7x"
    return "other"


def _default_tiles(gen):
    """Roofline-balanced (row, vocab) tile targets per generation.

    Per inner grid step the kernel streams tv*H*2 bytes of bf16 weight and
    does 2*tm*tv*H MXU flops, i.e. arithmetic intensity 2*tm/2 = tm flop/B on
    the dominant weight stream.  tm must clear peak_flops / HBM_BW:
      v5e  197 TF/s / 0.82 TB/s  -> tm >= ~240   -> 384
      v6e  918 TF/s / 1.35 TB/s  -> tm >= ~680   -> 768
      v7x  996 TF/s / 3.2  TB/s  -> tm >= ~311   -> 512 (fits 64 MiB VMEM)
    """
    return {
        "v5e": (384, 512),
        "v6e": (768, 512),
        "v7x": (512, 512),
    }.get(gen, (512, 512))


def _vmem_capacity_bytes(gen):
    """Physical VMEM per TensorCore (64 MiB on v7x, 128 MiB on v5e/v6e)."""
    phys = (64 << 20) if gen == "v7x" else (128 << 20)
    try:
        return min(int(pltpu.get_tpu_info().vmem_capacity_bytes), phys)
    except Exception:
        return phys


def _choose_tile(n, target, align):
    """Pick a tile for an axis of length n.

    Preference order: (a) the whole axis if it fits `target` (no alignment or
    padding needed); (b) the largest `align`-multiple divisor of n that is
    >= target/2 (no padding, no post-kernel slice copy); (c) an aligned
    `target` with padding.  Returns (tile, padded_n).
    """
    if n <= target:
        return n, n
    t = max((target // align) * align, align)
    floor = max(align, t // 2)
    cand = t
    while cand >= floor:
        if n % cand == 0:
            return cand, n
        cand -= align
    return t, _round_up(n, t)


def _plan(M, V, H, xb, wb, target_tm, target_tv, weight_buffers, budget):
    """Choose tiles / path so the double-buffered working set fits `budget`."""
    target_tm = max(8, target_tm)
    target_tv = max(128, target_tv)
    while True:
        tm, Mp = _choose_tile(M, target_tm, 8)
        tv, Vp = _choose_tile(V, target_tv, 128)
        n_vocab_tiles = Vp // tv
        weight_major = (Mp // tm) == 1
        if weight_major:
            wbuf = 2
            need = 2 * tm * H * xb + 2 * tv * H * wb + 2 * tm * tv * 4 + 2 * H * 4
        else:
            wbuf = weight_buffers if (weight_buffers and weight_buffers > 2
                                      and n_vocab_tiles >= 3) else 2
            need = (2 * tm * H * xb            # x tiles (double-buffered)
                    + wbuf * tv * H * wb       # weight tiles (multi-buffered)
                    + 2 * tm * tv * 4          # f32 output tiles
                    + 2 * H * 4                # gamma
                    + tm * H * wb)             # xn scratch
        if need <= budget or (target_tm <= 8 and target_tv <= 128):
            return tm, Mp, tv, Vp, weight_major, wbuf, need
        if target_tm > 8:
            target_tm = max(8, target_tm // 2)
        else:
            target_tv = max(128, target_tv // 2)


# --------------------------------------------------------------------------
# Kernels
# --------------------------------------------------------------------------

def _rmsnorm_lmhead_rows_kernel(x_ref, g_ref, w_ref, o_ref, xn_ref, *, eps):
    """Row-major path: grid = (row tiles, vocab tiles), vocab innermost.

    The RMSNorm of the row tile is computed once (at vocab index 0) into a
    VMEM scratch and reused for every vocab tile, so the inner loop is pure
    MXU + weight DMA.  The x tile keeps the same block index across the vocab
    axis, so it is fetched from HBM once per row tile.
    """
    @pl.when(pl.program_id(1) == 0)
    def _():
        x = x_ref[...].astype(jnp.float32)
        var = jnp.mean(x * x, axis=-1, keepdims=True)
        xn = x * jax.lax.rsqrt(var + eps) * g_ref[...]
        xn_ref[...] = xn.astype(xn_ref.dtype)

    # logits = xn @ W^T : contract the H axes directly (no in-kernel .T),
    # low-precision operands, f32 accumulation on the MXU.
    o_ref[...] = jax.lax.dot_general(
        xn_ref[...], w_ref[...],
        dimension_numbers=(((1,), (1,)), ((), ())),
        preferred_element_type=jnp.float32,
    )


def _rmsnorm_lmhead_vocab_kernel(x_ref, g_ref, w_ref, o_ref, *, eps):
    """Weight-major path (decode / small M): grid = (vocab tiles,).

    All rows form a single tile and stay resident; the lm_head weight is
    streamed from HBM exactly once.  The (tiny) RMSNorm is recomputed per
    vocab tile so there is no cross-step scratch dependency and the vocab
    axis can be 'parallel' (both v7x TensorCores stay busy at batch 1).
    """
    x = x_ref[...].astype(jnp.float32)
    var = jnp.mean(x * x, axis=-1, keepdims=True)
    xn = (x * jax.lax.rsqrt(var + eps) * g_ref[...]).astype(w_ref.dtype)
    o_ref[...] = jax.lax.dot_general(
        xn, w_ref[...],
        dimension_numbers=(((1,), (1,)), ((), ())),
        preferred_element_type=jnp.float32,
    )


# --------------------------------------------------------------------------
# Wrapper
# --------------------------------------------------------------------------

def prepare_lm_head_weight(lm_head_weight, compute_dtype=jnp.bfloat16):
    """One-time (model-load-time) cast of the lm_head weight to the MXU
    compute dtype, so the forward path never re-materializes the full [V, H]
    matrix per call (that cast is a full extra weight-sized HBM pass)."""
    return jnp.asarray(lm_head_weight, dtype=compute_dtype)


def language_model_final_forward(hidden_states, attention_mask, labels,
                                 norm_weight, lm_head_weight,
                                 *, eps=1e-6, tm=None, tv=None,
                                 compute_dtype=jnp.bfloat16,
                                 weight_buffers=3):
    """Equivalent of LanguageModelFinalWrapper.forward.

    hidden_states:  [B, S, H]
    norm_weight:    [H]        (RMSNorm gamma)
    lm_head_weight: [V, H]     (nn.Linear weight, no bias) -- ideally already
                               cast via prepare_lm_head_weight().
    Returns (logits_float32 [B, S, V], attention_mask, labels).
    """
    B, S, H = hidden_states.shape
    V = lm_head_weight.shape[0]
    M = B * S

    gen = _device_generation()
    d_tm, d_tv = _default_tiles(gen)
    target_tm = d_tm if tm is None else tm
    target_tv = d_tv if tv is None else tv

    xb = jnp.dtype(compute_dtype).itemsize
    wb = jnp.dtype(compute_dtype).itemsize

    vmem_cap = _vmem_capacity_bytes(gen)
    budget = vmem_cap - (6 << 20)

    tm, Mp, tv, Vp, weight_major, wbuf, vmem_need = _plan(
        M, V, H, xb, wb, target_tm, target_tv, weight_buffers, budget)
    n_row_tiles = Mp // tm
    n_vocab_tiles = Vp // tv

    # ---- operands (the big weight cast is hoisted via prepare_lm_head_weight)
    x2d = hidden_states.reshape(M, H)
    if x2d.dtype != compute_dtype:
        # Halves the x DMA bytes and the x-tile VMEM footprint.
        x2d = x2d.astype(compute_dtype)
    if Mp != M:
        x2d = jnp.pad(x2d, ((0, Mp - M), (0, 0)))

    g2d = norm_weight.astype(jnp.float32).reshape(1, H)

    w = lm_head_weight
    if w.dtype != compute_dtype:
        # Prefer prepare_lm_head_weight() at load time; per-call cast costs an
        # extra full-weight HBM pass.
        w = w.astype(compute_dtype)
    if Vp != V:
        # TODO(synk): for vocab sizes with no multiple-of-128 divisor near the
        # target tile, pad the weight once at load time instead of per call.
        w = jnp.pad(w, ((0, Vp - V), (0, 0)))

    # Always set the scoped-VMEM limit explicitly (v5e default is only 16 MiB,
    # v6e/v7x 32 MiB) and cap it at the real device capacity (64 MiB on v7x).
    vmem_limit = int(min(max(int(vmem_need * 1.3), 32 << 20),
                         vmem_cap - (2 << 20)))

    if not weight_major:
        kernel = functools.partial(_rmsnorm_lmhead_rows_kernel, eps=eps)
        w_spec = pl.BlockSpec((tv, H), lambda i, j: (j, 0))
        if wbuf > 2:
            try:  # 3-deep weight buffering hides DMA jitter behind the MXU.
                w_spec = pl.BlockSpec((tv, H), lambda i, j: (j, 0),
                                      pipeline_mode=pl.Buffered(wbuf))
            except (AttributeError, TypeError):
                pass  # older jax without pipeline_mode support
        grid = (n_row_tiles, n_vocab_tiles)
        in_specs = [
            pl.BlockSpec((tm, H), lambda i, j: (i, 0)),   # hidden rows (resident over j)
            pl.BlockSpec((1, H), lambda i, j: (0, 0)),    # rmsnorm gamma
            w_spec,                                       # lm_head rows
        ]
        out_specs = pl.BlockSpec((tm, tv), lambda i, j: (i, j))
        scratch_shapes = [pltpu.VMEM((tm, H), compute_dtype)]
        dim_sem = ("parallel", "arbitrary")
        bytes_accessed = (Mp * H * xb + n_row_tiles * Vp * H * wb
                          + Mp * Vp * 4 + H * 4)
        transcendentals = Mp
    else:
        kernel = functools.partial(_rmsnorm_lmhead_vocab_kernel, eps=eps)
        grid = (n_vocab_tiles,)
        in_specs = [
            pl.BlockSpec((Mp, H), lambda j: (0, 0)),      # all rows, resident
            pl.BlockSpec((1, H), lambda j: (0, 0)),       # rmsnorm gamma
            pl.BlockSpec((tv, H), lambda j: (j, 0)),      # lm_head rows (streamed once)
        ]
        out_specs = pl.BlockSpec((Mp, tv), lambda j: (0, j))
        scratch_shapes = ()
        dim_sem = ("parallel",)
        bytes_accessed = Mp * H * xb + Vp * H * wb + Mp * Vp * 4 + H * 4
        transcendentals = Mp * n_vocab_tiles

    cost = pl.CostEstimate(
        flops=2 * Mp * Vp * H,
        transcendentals=transcendentals,
        bytes_accessed=bytes_accessed,
    )

    logits2d = pl.pallas_call(
        kernel,
        out_shape=jax.ShapeDtypeStruct((Mp, Vp), jnp.float32),
        grid_spec=pltpu.PrefetchScalarGridSpec(
            num_scalar_prefetch=0,
            grid=grid,
            in_specs=in_specs,
            out_specs=out_specs,
            scratch_shapes=scratch_shapes,
        ),
        compiler_params=pltpu.CompilerParams(
            dimension_semantics=dim_sem,
            vmem_limit_bytes=vmem_limit,
        ),
        cost_estimate=cost,
    )(x2d, g2d, w)

    if Mp != M or Vp != V:
        logits2d = logits2d[:M, :V]
    logits = logits2d.reshape(B, S, V)
    return logits, attention_mask, labels


def _reference(hidden_states, norm_weight, lm_head_weight, eps=1e-6):
    x = hidden_states.astype(jnp.float32)
    var = jnp.mean(x * x, axis=-1, keepdims=True)
    xn = x * jax.lax.rsqrt(var + eps) * norm_weight.astype(jnp.float32)
    return jnp.einsum("bsh,vh->bsv", xn, lm_head_weight.astype(jnp.float32))


if __name__ == "__main__":
    key = jax.random.PRNGKey(0)
    k_x, k_w = jax.random.split(key)

    # Small shapes consistent with a tiny LLaMA-style LM head.
    B, S, H, V = 2, 8, 128, 512

    hidden_states = jax.random.normal(k_x, (B, S, H), dtype=jnp.float32)
    attention_mask = jnp.ones((B, S), dtype=jnp.int32)
    labels = jnp.arange(B * S, dtype=jnp.int32).reshape(B, S)

    norm_weight = jnp.ones((H,), dtype=jnp.float32)
    lm_head_weight = 0.02 * jax.random.normal(k_w, (V, H), dtype=jnp.float32)

    # One-time (load-time) weight cast, hoisted out of the forward path.
    lm_head_bf16 = prepare_lm_head_weight(lm_head_weight)

    ref = _reference(hidden_states, norm_weight, lm_head_weight)

    # 1) Small-M / decode-like path: single row tile, weight streamed exactly
    #    once, vocab axis 'parallel' (both v7x TensorCores used).
    logits, attn_out, labels_out = language_model_final_forward(
        hidden_states, attention_mask, labels, norm_weight, lm_head_bf16)
    jax.block_until_ready(logits)
    assert logits.dtype == jnp.float32
    assert logits.shape == (B, S, V)
    # bf16 activations + bf16 weight (f32 MXU accumulation) vs all-f32 ref.
    assert jnp.allclose(logits, ref, atol=2e-2, rtol=2e-2), (
        float(jnp.max(jnp.abs(logits - ref))))
    assert attn_out is attention_mask and labels_out is labels

    # 2) Force the large-M row-major path (multi row-tile grid, cached norm
    #    scratch, 3-deep weight buffering) with explicit small tiles.
    logits2, _, _ = language_model_final_forward(
        hidden_states, attention_mask, labels, norm_weight, lm_head_bf16,
        tm=8, tv=128)
    jax.block_until_ready(logits2)
    assert jnp.allclose(logits2, ref, atol=2e-2, rtol=2e-2), (
        float(jnp.max(jnp.abs(logits2 - ref))))

    print("KERNEL_OK")
</pallas_src>

<mosaic_0001>
module attributes {stable_mosaic.version = 11 : i64} {
  func.func @_rmsnorm_lmhead_vocab_kernel(%arg0: i32, %arg1: memref<16x128xbf16, #tpu.memory_space<vmem>>, %arg2: memref<1x128xf32, #tpu.memory_space<vmem>>, %arg3: memref<512x128xbf16, #tpu.memory_space<vmem>>, %arg4: memref<16x512xf32, #tpu.memory_space<vmem>>) attributes {dimension_semantics = [#tpu.dimension_semantics<parallel>], iteration_bounds = array<i64: 1>, scalar_prefetch = 0 : i64, scratch_operands = 0 : i64, tpu.core_type = #tpu.core_type<tc>, window_params = [{pipeline_mode = #tpu.pipeline_mode<synchronous>, transform_indices = @transform_0, window_bounds = array<i64: 16, 128>}, {pipeline_mode = #tpu.pipeline_mode<synchronous>, transform_indices = @transform_1, window_bounds = array<i64: 1, 128>}, {transform_indices = @transform_2, window_bounds = array<i64: 512, 128>}, {transform_indices = @transform_3, window_bounds = array<i64: 16, 512>}]} {
    %c0 = arith.constant 0 : index
    %c0_0 = arith.constant 0 : index
    %0 = vector.load %arg1[%c0, %c0_0] : memref<16x128xbf16, #tpu.memory_space<vmem>>, vector<16x128xbf16>
    %1 = arith.extf %0 : vector<16x128xbf16> to vector<16x128xf32>
    %2 = arith.mulf %1, %1 : vector<16x128xf32>
    %cst = arith.constant dense<0.000000e+00> : vector<16xf32>
    %3 = vector.multi_reduction <add>, %2, %cst [1] : vector<16x128xf32> to vector<16xf32>
    %4 = vector.shape_cast %3 : vector<16xf32> to vector<16x1xf32>
    %cst_1 = arith.constant 1.280000e+02 : f32
    %5 = vector.broadcast %cst_1 : f32 to vector<16x1xf32>
    %6 = arith.divf %4, %5 : vector<16x1xf32>
    %cst_2 = arith.constant 9.99999997E-7 : f32
    %7 = vector.broadcast %cst_2 : f32 to vector<16x1xf32>
    %8 = arith.addf %6, %7 : vector<16x1xf32>
    %9 = math.rsqrt %8 : vector<16x1xf32>
    %10 = vector.broadcast %9 : vector<16x1xf32> to vector<16x128xf32>
    %11 = arith.mulf %1, %10 : vector<16x128xf32>
    %c0_3 = arith.constant 0 : index
    %c0_4 = arith.constant 0 : index
    %12 = vector.load %arg2[%c0_3, %c0_4] : memref<1x128xf32, #tpu.memory_space<vmem>>, vector<1x128xf32>
    %13 = vector.broadcast %12 : vector<1x128xf32> to vector<16x128xf32>
    %14 = arith.mulf %11, %13 : vector<16x128xf32>
    %15 = arith.truncf %14 : vector<16x128xf32> to vector<16x128xbf16>
    %c0_5 = arith.constant 0 : index
    %c0_6 = arith.constant 0 : index
    %16 = vector.load %arg3[%c0_5, %c0_6] : memref<512x128xbf16, #tpu.memory_space<vmem>>, vector<512x128xbf16>
    %cst_7 = arith.constant dense<0.000000e+00> : vector<16x512xf32>
    %17 = tpu.matmul %15, %16, %cst_7 {dimension_numbers = #tpu.dot_dimension_numbers<[1], [1], [0], [0], [0, 0, 1, 0], [], []>} : vector<16x128xbf16>, vector<512x128xbf16>, vector<16x512xf32> -> vector<16x512xf32>
    %c0_8 = arith.constant 0 : index
    %c0_9 = arith.constant 0 : index
    %18 = vector.load %arg4[%c0_8, %c0_9] : memref<16x512xf32, #tpu.memory_space<vmem>>, vector<16x512xf32>
    tpu.vector_store %arg4[%c0_8, %c0_9], %17 {strides = array<i32>} : memref<16x512xf32, #tpu.memory_space<vmem>>, vector<16x512xf32>,
    return
  }
  func.func @transform_0(%arg0: i32) -> (i32, i32) {
    %c0_i32 = arith.constant 0 : i32
    %c0_i32_0 = arith.constant 0 : i32
    %c0_i32_1 = arith.constant 0 : i32
    return %c0_i32, %c0_i32_0 : i32, i32
  }
  func.func @transform_1(%arg0: i32) -> (i32, i32) {
    %c0_i32 = arith.constant 0 : i32
    %c0_i32_0 = arith.constant 0 : i32
    %c0_i32_1 = arith.constant 0 : i32
    return %c0_i32, %c0_i32_0 : i32, i32
  }
  func.func @transform_2(%arg0: i32) -> (i32, i32) {
    %c0_i32 = arith.constant 0 : i32
    %c0_i32_0 = arith.constant 0 : i32
    return %arg0, %c0_i32 : i32, i32
  }
  func.func @transform_3(%arg0: i32) -> (i32, i32) {
    %c0_i32 = arith.constant 0 : i32
    %c0_i32_0 = arith.constant 0 : i32
    return %c0_i32, %arg0 : i32, i32
  }
}

</mosaic_0001>

<bundles_post_ra>
// kernel: tpu_custom_call.1
= control target key start
LH: loop header
LB: loop body
LE: loop exit
PB: predicated region body
PF: predicated region fallthrough
CT: control target
= control target key end

     0   :  { %8 = vsyncpa [#allocation3], 0  ;;  %s705_s0 = inlined_call_operand.hbm [shape: bf16[16,128], index: 0, kind: input, shape index: {}]   ;;  %s706_s1 = inlined_call_operand.vmem [shape: f32[1,128], index: 1, kind: input, shape index: {}]   ;;  %s707_s2 = inlined_call_operand.hbm [shape: bf16[512,128], index: 2, kind: input, shape index: {}]   ;;  %s708_s3 = inlined_call_operand.hbm [shape: f32[16,512], index: 3, kind: output, shape index: {}]  }
   0x1   :  { %9 = vsyncpa [#allocation6], 0 }
   0x2   :  { %10 = vsyncpa [#allocation4], 0  ;;  %s629_s12 = smov [#allocation2]   ;;  %s557_s16 = scalar_lea.hbm %s705_s0, 128 }
   0x3   :  { %s16_s13 = sshll.u32 %s629_s12, 4  ;;  %p558_p0 = scmp.ne.s32.totalorder %s705_s0, %s557_s16  ;;  %s17_s13 = int_to_ptr.vmem [resolvable:$true] %s16_s13 }
   0x4   :  { %p561_p1 = scmp.lt.u32.totalorder %s557_s16, %s705_s0 }
   0x6   :  { %p563_p2 = pnand %p561_p1, %p558_p0 }
   0x8   :  { %566 = shalt.err (!%p563_p2)
}
   0x9   :  { %s567_s21 = scalar_lea.vmem %s17_s13, 128  ;;  %p572_p4 = scmp.lt.s32.totalorder %s17_s13, %s17_s13 }
   0xa   :  { %p568_p3 = scmp.ne.s32.totalorder %s17_s13, %s567_s21  ;;  %p573_p5 = scmp.lt.s32.totalorder %s567_s21, %s567_s21 }
   0xc   :  { %p574_p6 = por %p573_p5, %p572_p4 }
   0xe   :  { %p575_p7 = pnand %p574_p6, %p568_p3 }
  0x10   :  { %578 = shalt.err (!%p575_p7)
}
  0x11   :  { %s630_s22 = smov 64   ;;  %s631_s23 = smov 4  }
  0x12   :  { %22 = dma.hbm_to_vmem [thread:$0]  %s705_s0, 128, %s17_s13, [#allocation3], %s630_s22, %s630_s22, %s631_s23  }
  0x13   :  { %s632_s26 = smov [#allocation5]   ;;  %s579_s30 = scalar_lea.hbm %s707_s2, 4096 }
  0x14   :  { %s30_s27 = sshll.u32 %s632_s26, 4  ;;  %p580_p8 = scmp.ne.s32.totalorder %s707_s2, %s579_s30  ;;  %s31_s27 = int_to_ptr.vmem [resolvable:$true] %s30_s27 }
  0x15   :  { %p583_p9 = scmp.lt.u32.totalorder %s579_s30, %s707_s2 }
  0x17   :  { %p585_p10 = pnand %p583_p9, %p580_p8 }
  0x19   :  { %588 = shalt.err (!%p585_p10)
}
  0x1a   :  { %s589_s8 = scalar_lea.vmem %s31_s27, 4096  ;;  %p594_p12 = scmp.lt.s32.totalorder %s31_s27, %s31_s27 }
  0x1b   :  { %p590_p11 = scmp.ne.s32.totalorder %s31_s27, %s589_s8  ;;  %p595_p13 = scmp.lt.s32.totalorder %s589_s8, %s589_s8 }
  0x1d   :  { %p596_p0 = por %p595_p13, %p594_p12 }
  0x1f   :  { %p597_p1 = pnand %p596_p0, %p590_p11 }
  0x21   :  { %600 = shalt.err (!%p597_p1)
}
  0x22   :  { %36 = dma.hbm_to_vmem [thread:$0]  %s707_s2, 4096, %s31_s27, [#allocation6], %s630_s22, %s630_s22, %s631_s23  }
  0x23   :  { %623 = dma.done.wait [#allocation3], 128  }
  0x24   :  { %624 = vsyncadd [#allocation3], 4294967168 }
  0x25   :  { %625 = dma.done.wait [#allocation6], 4096  }
  0x26   :  { %626 = vsyncadd [#allocation6], 4294963200  ;;  %v475_v0 = vld [vmem:[#allocation2] sm:$0xff]   ;;  %v521_v3 = vld [vmem:[#allocation5 + $0x40] sm:$0xff]   ;;  %s633_s11 = smov [#allocation7]  }
  0x27   :  { %v680_v1 = vunpack.c.l.bf16 %v475_v0  ;;  %v682_v2 = vunpack.c.h.bf16 %v475_v0  ;;  %v522_v4 = vld [vmem:[#allocation5 + $0xc0] sm:$0xff]   ;;  %478 = vmatprep.subr.bf16.mxu0 %v521_v3  ;;  %v525_v9 = vld [vmem:[#allocation5 + $0x48] sm:$0xff]   ;;  %v529_v13 = vld [vmem:[#allocation5 + $0x50] sm:$0xff]   ;;  %s428_s12 = sshll.u32 %s633_s11, 4  ;;  %s429_s12 = int_to_ptr.vmem [resolvable:$true] %s428_s12 }
  0x28   :  { %v523_v6 = vld [vmem:[#allocation5] sm:$0xff]   ;;  %496 = vmatprep.subr.bf16.mxu1 %v522_v4  ;;  %v526_v10 = vld [vmem:[#allocation5 + $0xc8] sm:$0xff]   ;;  %v530_v14 = vld [vmem:[#allocation5 + $0xd0] sm:$0xff]   ;;  %p606_p3 = scmp.lt.s32.totalorder %s429_s12, %s429_s12 }
  0x29   :  { %v48_v5 = vmul.f32 %v680_v1, %v680_v1  ;;  %v524_v7 = vld [vmem:[#allocation5 + $0x80] sm:$0xff]   ;;  %v49_v8 = vmul.f32 %v682_v2, %v682_v2  ;;  %479 = vmatpush3.bf16.xpose.msra.mxu0 %v523_v6  ;;  %v527_v11 = vld [vmem:[#allocation5 + $0x8] sm:$0xff]   ;;  %v531_v15 = vld [vmem:[#allocation5 + $0x10] sm:$0xff]  }
  0x2a   :  { %497 = vmatpush3.bf16.xpose.msra.mxu1 %v524_v7  ;;  %480 = vmatprep.subr.bf16.mxu0 %v525_v9  ;;  %v528_v12 = vld [vmem:[#allocation5 + $0x88] sm:$0xff]   ;;  %v532_v16 = vld [vmem:[#allocation5 + $0x90] sm:$0xff]   ;;  %v533_v17 = vld [vmem:[#allocation5 + $0x58] sm:$0xff]  }
  0x2b   :  { %50 = vadd.xlane.f32.xlu0 %v48_v5  ;;  %498 = vmatprep.subr.bf16.mxu1 %v526_v10  ;;  %v534_v18 = vld [vmem:[#allocation5 + $0xd8] sm:$0xff]   ;;  %v537_v21 = vld [vmem:[#allocation5 + $0x60] sm:$0xff]   ;;  %v541_v25 = vld [vmem:[#allocation5 + $0x68] sm:$0xff]  }
  0x2c   :  { %v535_v19 = vld [vmem:[#allocation5 + $0x18] sm:$0xff]   ;;  %v538_v22 = vld [vmem:[#allocation5 + $0xe0] sm:$0xff]   ;;  %v542_v26 = vld [vmem:[#allocation5 + $0xe8] sm:$0xff]  }
  0x2d   :  { %v536_v20 = vld [vmem:[#allocation5 + $0x98] sm:$0xff]   ;;  %v539_v23 = vld [vmem:[#allocation5 + $0x20] sm:$0xff]   ;;  %v543_v27 = vld [vmem:[#allocation5 + $0x28] sm:$0xff]  }
  0x2e   :  { %v540_v24 = vld [vmem:[#allocation5 + $0xa0] sm:$0xff]   ;;  %v544_v28 = vld [vmem:[#allocation5 + $0xa8] sm:$0xff]   ;;  %v545_v29 = vld [vmem:[#allocation5 + $0x70] sm:$0xff]  }
  0x2f   :  { %52 = vadd.xlane.f32.xlu0 %v49_v8  ;;  %v546_v30 = vld [vmem:[#allocation5 + $0xf0] sm:$0xff]   ;;  %v549_v33 = vld [vmem:[#allocation5 + $0x78] sm:$0xff]  }
  0x30   :  { %v547_v31 = vld [vmem:[#allocation5 + $0x30] sm:$0xff]   ;;  %v550_v34 = vld [vmem:[#allocation5 + $0xf8] sm:$0xff]  }
  0x31   :  { %481 = vmatpush3.bf16.xpose.msra.mxu0 %v527_v11  ;;  %v548_v32 = vld [vmem:[#allocation5 + $0xb0] sm:$0xff]   ;;  %v551_v35 = vld [vmem:[#allocation5 + $0x38] sm:$0xff]  }
  0x32   :  { %499 = vmatpush3.bf16.xpose.msra.mxu1 %v528_v12  ;;  %482 = vmatprep.subr.bf16.mxu0 %v529_v13  ;;  %v552_v36 = vld [vmem:[#allocation5 + $0xb8] sm:$0xff]  }
  0x33   :  { %500 = vmatprep.subr.bf16.mxu1 %v530_v14  ;;  %v441_v46 = vld [vmem:[%s706_s1] ss:$0 sm:$0xff]  ;;  %s601_s1 = scalar_lea.vmem %s429_s12, 1024 }
  0x34   :  { %p602_p2 = scmp.ne.s32.totalorder %s429_s12, %s601_s1  ;;  %p607_p4 = scmp.lt.s32.totalorder %s601_s1, %s601_s1 }
  0x36   :  { %p608_p5 = por %p607_p4, %p606_p3 }
  0x38   :  { %p609_p6 = pnand %p608_p5, %p602_p2 }
  0x39   :  { %483 = vmatpush3.bf16.xpose.msra.mxu0 %v531_v15 }
  0x3a   :  { %501 = vmatpush3.bf16.xpose.msra.mxu1 %v532_v16  ;;  %484 = vmatprep.subr.bf16.mxu0 %v533_v17 }
  0x3b   :  { %502 = vmatprep.subr.bf16.mxu1 %v534_v18 }
  0x41   :  { %485 = vmatpush3.bf16.xpose.msra.mxu0 %v535_v19 }
  0x42   :  { %503 = vmatpush3.bf16.xpose.msra.mxu1 %v536_v20  ;;  %486 = vmatprep.subr.bf16.mxu0 %v537_v21 }
  0x43   :  { %504 = vmatprep.subr.bf16.mxu1 %v538_v22 }
  0x49   :  { %487 = vmatpush3.bf16.xpose.msra.mxu0 %v539_v23 }
  0x4a   :  { %505 = vmatpush3.bf16.xpose.msra.mxu1 %v540_v24  ;;  %488 = vmatprep.subr.bf16.mxu0 %v541_v25 }
  0x4b   :  { %506 = vmatprep.subr.bf16.mxu1 %v542_v26 }
  0x51   :  { %489 = vmatpush3.bf16.xpose.msra.mxu0 %v543_v27 }
  0x52   :  { %507 = vmatpush3.bf16.xpose.msra.mxu1 %v544_v28  ;;  %490 = vmatprep.subr.bf16.mxu0 %v545_v29 }
  0x53   :  { %508 = vmatprep.subr.bf16.mxu1 %v546_v30 }
  0x59   :  { %491 = vmatpush3.bf16.xpose.msra.mxu0 %v547_v31 }
  0x5a   :  { %509 = vmatpush3.bf16.xpose.msra.mxu1 %v548_v32  ;;  %492 = vmatprep.subr.bf16.mxu0 %v549_v33 }
  0x5b   :  { %510 = vmatprep.subr.bf16.mxu1 %v550_v34 }
  0x61   :  { %493 = vmatpush3.bf16.xpose.msra.mxu0 %v551_v35 }
  0x62   :  { %511 = vmatpush3.bf16.xpose.msra.mxu1 %v552_v36 }
  0xb8   :  { %v51_v37 = vpop.xlane.xlu0 %50 }
  0xb9   :  { %v55_v38 = vmul.f32 0.0078125, %v51_v37 }
  0xbb   :  { %v57_v39 = vadd.f32 1e-06, %v55_v38 }
  0xbc   :  { %v53_v40 = vpop.xlane.xlu0 %52 }
  0xbd   :  { %553 = vrsqrt.f32 %v57_v39  ;;  %v56_v41 = vmul.f32 0.0078125, %v53_v40 }
  0xbf   :  { %v58_v42 = vadd.f32 1e-06, %v56_v41 }
  0xc1   :  { %555 = vrsqrt.f32 %v58_v42 }
  0xc7   :  { %v554_v43 = vpop.eup %553 }
  0xc8   :  { %v61_v44 = vmul.f32 %v554_v43, %v680_v1 }
  0xca   :  { %v70_v48 = vmul.f32 %v441_v46, %v61_v44 }
  0xcb   :  { %v556_v45 = vpop.eup %555 }
  0xcc   :  { %v62_v47 = vmul.f32 %v556_v45, %v682_v2 }
  0xce   :  { %v71_v49 = vmul.f32 %v441_v46, %v62_v47 }
  0xd0   :  { %v72_v50 = vpack.c.bf16 %v71_v49, %v70_v48 }
  0xd2   :  { %494 = vmatprep.mubr.bf16.mxu0 %v72_v50  ;;  %512 = vmatprep.mubr.bf16.mxu1 %v72_v50 }
  0xd3   :  { %495 = vmatmul.mubr.bf16.vlgmr.msra.gmra.mrb[0].mxu0 %v72_v50  ;;  %513 = vmatmul.mubr.bf16.vlgmr.msra.gmra.mrb[0].mxu1 %v72_v50 }
 0x1a6   :  { %v363_v51 = vpop.f32.mrb[0].mxu0  ;;  %v406_v52 = vpop.f32.mrb[0].mxu1 }
 0x1a7   :  { %415 = vst [vmem:[#allocation7] sm:$0xff] %v363_v51  ;;  %417 = vst [vmem:[#allocation7 + $0x10] sm:$0xff] %v406_v52  ;;  %v365_v53 = vpop.f32.mrb[1].mxu0  ;;  %v408_v54 = vpop.f32.mrb[1].mxu1 }
 0x1a8   :  { %416 = vst [vmem:[#allocation7 + $0x8] sm:$0xff] %v365_v53  ;;  %418 = vst [vmem:[#allocation7 + $0x18] sm:$0xff] %v408_v54  ;;  %v367_v55 = vpop.f32.mrb[2].mxu0  ;;  %v410_v56 = vpop.f32.mrb[2].mxu1 }
 0x1a9   :  { %419 = vst [vmem:[#allocation7 + $0x20] sm:$0xff] %v367_v55  ;;  %421 = vst [vmem:[#allocation7 + $0x30] sm:$0xff] %v410_v56  ;;  %v369_v57 = vpop.f32.mrb[3].mxu0  ;;  %v412_v58 = vpop.f32.mrb[3].mxu1 }
 0x1aa   :  { %420 = vst [vmem:[#allocation7 + $0x28] sm:$0xff] %v369_v57  ;;  %422 = vst [vmem:[#allocation7 + $0x38] sm:$0xff] %v412_v58 }
 0x1ab   :  { %612 = shalt.err (!%p609_p6)
}
 0x1ac   :  { %s613_s15 = scalar_lea.hbm %s708_s3, 1024 }
 0x1ad   :  { %p614_p7 = scmp.ne.s32.totalorder %s708_s3, %s613_s15  ;;  %p617_p8 = scmp.lt.u32.totalorder %s613_s15, %s708_s3 }
 0x1af   :  { %p619_p9 = pnand %p617_p8, %p614_p7 }
 0x1b1   :  { %622 = shalt.err (!%p619_p9)
}
 0x1b2   :  { %s634_s20 = smov 512   ;;  %s635_s21 = smov 32  }
 0x1b3   :  { %434 = dma.vmem_to_hbm [thread:$0]  %s429_s12, 1024, %s708_s3, [#allocation4], %s634_s20, %s634_s20, %s635_s21  }
 0x1b4   :  { %627 = dma.done.wait [#allocation4], 1024  }
 0x1b5   :  { %628 = vsyncadd [#allocation4], 4294966272 }
 0x1b6   :  { %438 = vsyncpa [#allocation3], 1 }
 0x1b7   :  { %439 = vsyncpa [#allocation6], 1 }
 0x1b8   :  { %440 = vsyncpa [#allocation4], 1 }

</bundles_post_ra>
